<compile_context>
chip_gen: v7x
topology: tpu7x:2x2x1
jax: 0.10.0
libtpu: 0.0.40
codegen_flags: <defaults>
</compile_context>

<pallas_src>
import jax
import jax.numpy as jnp
from jax.experimental import pallas as pl
from jax.experimental.pallas import tpu as pltpu


def _yolo_kernel(params_ref, grid_ref, pred_ref, out_ref):
    """Decode one (bb, rows_pad, gg_chunk) slab.

    params_ref: (rows_pad, 4)  per-row [is_exp, mul, sel_x, sel_y]  (resident)
    grid_ref:   (2, gg_chunk)  [grid_x; grid_y] cell offsets
    pred_ref:   (bb, rows_pad, gg_chunk) raw predictions, channel-major
    out_ref:    (bb, rows_pad, gg_chunk) decoded output, channel-major
    """
    p = pred_ref[...].astype(jnp.float32)          # in-register upcast

    prm = params_ref[...]                          # (R, 4) f32, resident
    is_exp = prm[:, 0:1][None]                     # (1, R, 1)
    mul = prm[:, 1:2][None]                        # stride | anchor*stride | 1
    sel_x = prm[:, 2:3][None]                      # 1.0 on bx rows
    sel_y = prm[:, 3:4][None]                      # 1.0 on by rows

    g = grid_ref[...]                              # (2, L)
    gx = g[0:1, :][None]                           # (1, 1, L)
    gy = g[1:2, :][None]                           # (1, 1, L)

    e = jnp.exp(-p)                                # single EUP transcendental
    sig = 1.0 / (1.0 + e)                          # sigmoid(p)
    ex = 1.0 / e                                   # exp(p), exact reciprocal
    offset = sel_x * gx + sel_y * gy               # (1, R, L)

    val = jnp.where(is_exp > 0.5, ex, sig + offset)
    out_ref[...] = (val * mul).astype(out_ref.dtype)   # one dense full-tile store


def _round_up(x, m):
    return (x + m - 1) // m * m


def _select_tiling(B, rows_pad, gg_pad, in_bytes, out_bytes):
    """Pick (bb, gg_chunk): ~<=2 MiB blocks, <=3 MiB/buffer, >=2 grid steps."""
    per_buf_cap = 3 << 20     # 2x in + 2x out buffers stay under v5e's 16 MiB
    target = 2 << 20          # sweet spot for DMA efficiency / step overhead
    elem_bytes = max(in_bytes, out_bytes)

    # gg chunk: multiple of 128 that divides gg_pad and keeps one row-slab
    # under the per-buffer cap (prefer the largest -> lane-dense, few steps).
    n128 = gg_pad // 128
    chunk_cands = [d * 128 for d in range(1, n128 + 1) if n128 % d == 0]
    gg_chunk = 128
    for c in chunk_cands:
        if rows_pad * c * elem_bytes <= per_buf_cap:
            gg_chunk = c
    n_gg = gg_pad // gg_chunk

    # batch block: divisor of B, block under target, keep >=2 total grid steps
    # (both v7x TensorCores) whenever >=2 steps are achievable at all.
    bb = 1
    for cand in range(1, B + 1):
        if B % cand:
            continue
        blk = cand * rows_pad * gg_chunk * elem_bytes
        if blk > min(target, per_buf_cap):
            break
        if (B // cand) * n_gg < 2 and B * n_gg >= 2:
            break
        bb = cand

    # B == 1 with a single gg chunk: split gg so the 2nd TC gets work (v7x).
    if (B // bb) * n_gg < 2 and n128 >= 2:
        proper = [c for c in chunk_cands if c < gg_pad]
        if proper:
            gg_chunk = proper[-1]
    return bb, gg_chunk


def yolo_layer_forward(x, anchors, num_classes, img_size=416,
                       out_dtype=None, channel_major=False):
    """Pallas implementation of YOLOLayer.forward.

    x:       (B, A*(num_classes+5), G, G)  NCHW, any float dtype
    anchors: (A, 2) float
    returns: (B, A*G*G, 5+num_classes)  (or (B, A*c5, G*G) if channel_major)
    """
    B, C, G, G2 = x.shape
    assert G == G2
    A = anchors.shape[0]
    c5 = num_classes + 5
    assert C == A * c5, "channel dim must equal num_anchors*(num_classes+5)"
    stride = float(img_size // G)        # floor div, matching the PyTorch module
    gg = G * G
    rows = A * c5
    gg_pad = _round_up(gg, 128)          # lane-dense stores
    rows_pad = _round_up(rows, 8)        # sublane-dense rows (e.g. 255 -> 256)
    out_dtype = x.dtype if out_dtype is None else out_dtype

    # Channel-major slab in the network's native dtype (no wrapper upcast).
    pred = x.reshape(B, rows, gg)
    if rows_pad != rows or gg_pad != gg:
        pred = jnp.pad(pred, ((0, 0), (0, rows_pad - rows), (0, gg_pad - gg)))

    anchors = anchors.astype(jnp.float32)

    # Per-row parameter table (rows_pad, 4); rows are (anchor a, channel c).
    c_idx = jnp.tile(jnp.arange(c5, dtype=jnp.int32), A)            # (rows,)
    aw = jnp.repeat(anchors[:, 0], c5)
    ah = jnp.repeat(anchors[:, 1], c5)
    is_exp = ((c_idx == 2) | (c_idx == 3)).astype(jnp.float32)
    mul = jnp.where(c_idx < 2, stride,
          jnp.where(c_idx == 2, aw * stride,
          jnp.where(c_idx == 3, ah * stride, 1.0))).astype(jnp.float32)
    sel_x = (c_idx == 0).astype(jnp.float32)
    sel_y = (c_idx == 1).astype(jnp.float32)
    row_params = jnp.stack([is_exp, mul, sel_x, sel_y], axis=1)     # (rows, 4)
    if rows_pad != rows:
        row_params = jnp.pad(row_params, ((0, rows_pad - rows), (0, 0)))

    # Grid offset table (2, gg_pad): row-major spatial flatten, k = gy*G + gx.
    gi = jnp.arange(gg_pad, dtype=jnp.int32)
    grid_tab = jnp.stack([(gi % G).astype(jnp.float32),
                          (gi // G).astype(jnp.float32)], axis=0)    # (2, gg_pad)

    in_bytes = jnp.dtype(pred.dtype).itemsize
    out_bytes = jnp.dtype(out_dtype).itemsize
    bb, gg_chunk = _select_tiling(B, rows_pad, gg_pad, in_bytes, out_bytes)
    grid = (B // bb, gg_pad // gg_chunk)

    out = pl.pallas_call(
        _yolo_kernel,
        out_shape=jax.ShapeDtypeStruct((B, rows_pad, gg_pad), out_dtype),
        grid=grid,
        in_specs=[
            # tiny tables: same (or lane-sliced) block every step -> resident
            pl.BlockSpec((rows_pad, 4), lambda b, g: (0, 0)),
            pl.BlockSpec((2, gg_chunk), lambda b, g: (0, g)),
            # fused batch slab, lane-dense chunks
            pl.BlockSpec((bb, rows_pad, gg_chunk), lambda b, g: (b, 0, g)),
        ],
        out_specs=pl.BlockSpec((bb, rows_pad, gg_chunk), lambda b, g: (b, 0, g)),
        compiler_params=pltpu.CompilerParams(
            dimension_semantics=("parallel", "parallel")),
    )(row_params, grid_tab, pred)

    # Strip padding before any reshape so pad lanes/rows never interleave.
    out = out[:, :rows, :gg]
    if channel_major:
        return out                        # (B, A*c5, G*G), skips the HBM transpose
    # Layout plumbing only: match the PyTorch return layout.
    return jnp.transpose(out.reshape(B, A, c5, gg), (0, 1, 3, 2)).reshape(
        B, A * gg, c5)


def yolo_layer_ref(x, anchors, num_classes, img_size=416):
    """Pure-JAX reference mirroring the PyTorch forward exactly."""
    B, C, G, _ = x.shape
    A = anchors.shape[0]
    c5 = num_classes + 5
    stride = img_size // G
    xf = x.astype(jnp.float32)
    pred = xf.reshape(B, A, c5, G, G).transpose(0, 1, 3, 4, 2)   # (B,A,G,G,c5)
    xs = jax.nn.sigmoid(pred[..., 0])
    ys = jax.nn.sigmoid(pred[..., 1])
    w = pred[..., 2]
    h = pred[..., 3]
    conf = jax.nn.sigmoid(pred[..., 4])
    cls = jax.nn.sigmoid(pred[..., 5:])
    gx = jnp.arange(G, dtype=jnp.float32)[None, None, None, :]
    gy = jnp.arange(G, dtype=jnp.float32)[None, None, :, None]
    bx = xs + gx
    by = ys + gy
    anchors = anchors.astype(jnp.float32)
    bw = jnp.exp(w) * anchors[:, 0].reshape(1, A, 1, 1)
    bh = jnp.exp(h) * anchors[:, 1].reshape(1, A, 1, 1)
    boxes = jnp.stack([bx, by, bw, bh], axis=-1).reshape(B, -1, 4) * stride
    return jnp.concatenate(
        [boxes, conf.reshape(B, -1, 1), cls.reshape(B, -1, num_classes)], axis=-1)


if __name__ == "__main__":
    key = jax.random.PRNGKey(0)

    # Case 1: B=2, A=3, num_classes=3, G=16 (gg already a multiple of 128).
    B, A, num_classes, G, img_size = 2, 3, 3, 16, 416
    C = A * (num_classes + 5)                     # 24
    k1, k2 = jax.random.split(key)
    x1 = jax.random.normal(k1, (B, C, G, G), dtype=jnp.float32)
    anchors1 = jnp.array([[10.0, 13.0], [16.0, 30.0], [33.0, 23.0]],
                         dtype=jnp.float32)
    out1 = jax.block_until_ready(yolo_layer_forward(x1, anchors1, num_classes,
                                                    img_size))
    ref1 = yolo_layer_ref(x1, anchors1, num_classes, img_size)
    assert out1.shape == (B, A * G * G, num_classes + 5), out1.shape
    assert jnp.allclose(out1, ref1, rtol=1e-3, atol=1e-3), float(
        jnp.max(jnp.abs(out1 - ref1)))

    # Case 2: B=1, A=3, num_classes=2, G=13 -> exercises lane/sublane padding
    # (gg=169 -> 256, rows=21 -> 24) and the B==1 gg-split path (2 grid steps).
    B2, A2, nc2, G2, img2 = 1, 3, 2, 13, 416
    C2 = A2 * (nc2 + 5)                           # 21
    x2 = jax.random.normal(k2, (B2, C2, G2, G2), dtype=jnp.float32)
    anchors2 = jnp.array([[30.0, 61.0], [62.0, 45.0], [59.0, 119.0]],
                         dtype=jnp.float32)
    out2 = jax.block_until_ready(yolo_layer_forward(x2, anchors2, nc2, img2))
    ref2 = yolo_layer_ref(x2, anchors2, nc2, img2)
    assert out2.shape == (B2, A2 * G2 * G2, nc2 + 5), out2.shape
    assert jnp.allclose(out2, ref2, rtol=1e-3, atol=1e-3), float(
        jnp.max(jnp.abs(out2 - ref2)))

    print("KERNEL_OK")
</pallas_src>

<mosaic_0001>
module attributes {stable_mosaic.version = 11 : i64} {
  func.func @_yolo_kernel(%arg0: i32, %arg1: i32, %arg2: memref<24x4xf32, #tpu.memory_space<vmem>>, %arg3: memref<2x256xf32, #tpu.memory_space<vmem>>, %arg4: memref<1x24x256xf32, #tpu.memory_space<vmem>>, %arg5: memref<1x24x256xf32, #tpu.memory_space<vmem>>) attributes {dimension_semantics = [#tpu.dimension_semantics<parallel>, #tpu.dimension_semantics<parallel>], iteration_bounds = array<i64: 2, 1>, scalar_prefetch = 0 : i64, scratch_operands = 0 : i64, tpu.core_type = #tpu.core_type<tc>, window_params = [{pipeline_mode = #tpu.pipeline_mode<synchronous>, transform_indices = @transform_0, window_bounds = array<i64: 24, 4>}, {transform_indices = @transform_1, window_bounds = array<i64: 2, 256>}, {transform_indices = @transform_2, window_bounds = array<i64: 1, 24, 256>}, {transform_indices = @transform_3, window_bounds = array<i64: 1, 24, 256>}]} {
    %c0 = arith.constant 0 : index
    %c0_0 = arith.constant 0 : index
    %c0_1 = arith.constant 0 : index
    %0 = vector.load %arg4[%c0, %c0_0, %c0_1] : memref<1x24x256xf32, #tpu.memory_space<vmem>>, vector<1x24x256xf32>
    %c0_2 = arith.constant 0 : index
    %c0_3 = arith.constant 0 : index
    %1 = vector.load %arg2[%c0_2, %c0_3] : memref<24x4xf32, #tpu.memory_space<vmem>>, vector<24x4xf32>
    %2 = vector.extract_strided_slice %1 {offsets = [0, 0], sizes = [24, 1], strides = [1, 1]} : vector<24x4xf32> to vector<24x1xf32>
    %3 = vector.shape_cast %2 : vector<24x1xf32> to vector<1x24x1xf32>
    %4 = vector.extract_strided_slice %1 {offsets = [0, 1], sizes = [24, 1], strides = [1, 1]} : vector<24x4xf32> to vector<24x1xf32>
    %5 = vector.shape_cast %4 : vector<24x1xf32> to vector<1x24x1xf32>
    %6 = vector.extract_strided_slice %1 {offsets = [0, 2], sizes = [24, 1], strides = [1, 1]} : vector<24x4xf32> to vector<24x1xf32>
    %7 = vector.shape_cast %6 : vector<24x1xf32> to vector<1x24x1xf32>
    %8 = vector.extract_strided_slice %1 {offsets = [0, 3], sizes = [24, 1], strides = [1, 1]} : vector<24x4xf32> to vector<24x1xf32>
    %9 = vector.shape_cast %8 : vector<24x1xf32> to vector<1x24x1xf32>
    %c0_4 = arith.constant 0 : index
    %c0_5 = arith.constant 0 : index
    %10 = vector.load %arg3[%c0_4, %c0_5] : memref<2x256xf32, #tpu.memory_space<vmem>>, vector<2x256xf32>
    %11 = vector.extract_strided_slice %10 {offsets = [0, 0], sizes = [1, 256], strides = [1, 1]} : vector<2x256xf32> to vector<1x256xf32>
    %12 = vector.shape_cast %11 : vector<1x256xf32> to vector<1x1x256xf32>
    %13 = vector.extract_strided_slice %10 {offsets = [1, 0], sizes = [1, 256], strides = [1, 1]} : vector<2x256xf32> to vector<1x256xf32>
    %14 = vector.shape_cast %13 : vector<1x256xf32> to vector<1x1x256xf32>
    %cst = arith.constant 0.000000e+00 : f32
    %15 = vector.broadcast %cst : f32 to vector<1x24x256xf32>
    %16 = arith.subf %15, %0 : vector<1x24x256xf32>
    %17 = math.exp %16 : vector<1x24x256xf32>
    %cst_6 = arith.constant 1.000000e+00 : f32
    %18 = vector.broadcast %cst_6 : f32 to vector<1x24x256xf32>
    %19 = arith.addf %18, %17 : vector<1x24x256xf32>
    %cst_7 = arith.constant 1.000000e+00 : f32
    %20 = vector.broadcast %cst_7 : f32 to vector<1x24x256xf32>
    %21 = arith.divf %20, %19 : vector<1x24x256xf32>
    %cst_8 = arith.constant 1.000000e+00 : f32
    %22 = vector.broadcast %cst_8 : f32 to vector<1x24x256xf32>
    %23 = arith.divf %22, %17 : vector<1x24x256xf32>
    %24 = vector.broadcast %7 : vector<1x24x1xf32> to vector<1x24x256xf32>
    %25 = vector.broadcast %12 : vector<1x1x256xf32> to vector<1x24x256xf32>
    %26 = arith.mulf %24, %25 : vector<1x24x256xf32>
    %27 = vector.broadcast %9 : vector<1x24x1xf32> to vector<1x24x256xf32>
    %28 = vector.broadcast %14 : vector<1x1x256xf32> to vector<1x24x256xf32>
    %29 = arith.mulf %27, %28 : vector<1x24x256xf32>
    %30 = arith.addf %26, %29 : vector<1x24x256xf32>
    %cst_9 = arith.constant 5.000000e-01 : f32
    %31 = vector.broadcast %cst_9 : f32 to vector<1x24x1xf32>
    %32 = arith.cmpf ogt, %3, %31 : vector<1x24x1xf32>
    %33 = arith.addf %21, %30 : vector<1x24x256xf32>
    %34 = vector.shape_cast %32 : vector<1x24x1xi1> to vector<1x24x1xi1>
    %35 = vector.broadcast %34 : vector<1x24x1xi1> to vector<1x24x256xi1>
    %36 = arith.select %35, %23, %33 : vector<1x24x256xi1>, vector<1x24x256xf32>
    %37 = vector.broadcast %5 : vector<1x24x1xf32> to vector<1x24x256xf32>
    %38 = arith.mulf %36, %37 : vector<1x24x256xf32>
    %c0_10 = arith.constant 0 : index
    %c0_11 = arith.constant 0 : index
    %c0_12 = arith.constant 0 : index
    %39 = vector.load %arg5[%c0_10, %c0_11, %c0_12] : memref<1x24x256xf32, #tpu.memory_space<vmem>>, vector<1x24x256xf32>
    tpu.vector_store %arg5[%c0_10, %c0_11, %c0_12], %38 {strides = array<i32>} : memref<1x24x256xf32, #tpu.memory_space<vmem>>, vector<1x24x256xf32>,
    return
  }
  func.func @transform_0(%arg0: i32, %arg1: i32) -> (i32, i32) {
    %c0_i32 = arith.constant 0 : i32
    %c0_i32_0 = arith.constant 0 : i32
    %c0_i32_1 = arith.constant 0 : i32
    return %c0_i32, %c0_i32_0 : i32, i32
  }
  func.func @transform_1(%arg0: i32, %arg1: i32) -> (i32, i32) {
    %c0_i32 = arith.constant 0 : i32
    %c0_i32_0 = arith.constant 0 : i32
    return %c0_i32, %arg1 : i32, i32
  }
  func.func @transform_2(%arg0: i32, %arg1: i32) -> (i32, i32, i32) {
    %c0_i32 = arith.constant 0 : i32
    %c0_i32_0 = arith.constant 0 : i32
    return %arg0, %c0_i32, %arg1 : i32, i32, i32
  }
  func.func @transform_3(%arg0: i32, %arg1: i32) -> (i32, i32, i32) {
    %c0_i32 = arith.constant 0 : i32
    %c0_i32_0 = arith.constant 0 : i32
    return %arg0, %c0_i32, %arg1 : i32, i32, i32
  }
}

</mosaic_0001>

<bundles_post_ra>
// kernel: tpu_custom_call.1
= control target key start
LH: loop header
LB: loop body
LE: loop exit
PB: predicated region body
PF: predicated region fallthrough
CT: control target
= control target key end

     0   :  { %8 = vsyncpa [#allocation3], 0  ;;  %s1018_s0 = inlined_call_operand.vmem [shape: f32[24,4], index: 0, kind: input, shape index: {}]   ;;  %s1019_s1 = inlined_call_operand.vmem [shape: f32[2,256], index: 1, kind: input, shape index: {}]   ;;  %s1020_s2 = inlined_call_operand.hbm [shape: f32[2,24,256], index: 2, kind: input, shape index: {}]   ;;  %s1021_s3 = inlined_call_operand.hbm [shape: f32[2,24,256], index: 3, kind: output, shape index: {}]  }
   0x1   :  { %10 = vsyncpa [#allocation3 + $0x1], 0 }
   0x2   :  { %11 = vsyncpa [#allocation4], 0 }
   0x3   :  { %13 = vsyncpa [#allocation4 + $0x1], 0  ;;  %s815_s12 = smov 0   ;;  %s817_s13 = smov 0  }
   0x4   :  { %s819_s14 = smov 0   ;;  %s821_s15 = smov 0  }
   0x5   :  { %s823_s16 = smov 0   ;;  %s825_s17 = smov 0  }
   0x6 LB: > { %s543_s18 = sadd.s32 4294967295, %s783_s17   ;;  %s544_s19 = sadd.s32 4294967294, %s783_s17   ;;  %s783_s17 = sphi %s825_s17, %s19_s17   ;;  %s779_s16 = sphi %s823_s16, %s1036_s16   ;;  %s775_s15 = sphi %s821_s15, %s1035_s15   ;;  %s771_s14 = sphi %s819_s14, %s1034_s14   ;;  %s767_s13 = sphi %s817_s13, %s1033_s13   ;;  %s763_s12 = sphi %s815_s12, %s1032_s12  }
   0x7   : > { %s31_s20 = sadd.s32 1, %s779_s16  ;;  %s87_s21 = sadd.s32 1, %s771_s14 }
   0x8   : > { %p33_p0 = scmp.ge.s32.totalorder %s31_s20, 2  ;;  %p94_p1 = scmp.ne.s32.totalorder %s771_s14, %s767_s13 }
   0x9   : > { %p95_p2 = scmp.eq.s32.totalorder %s783_s17, 0  ;;  %p100_p3 = scmp.ne.s32.totalorder %s767_s13, %s763_s12 }
   0xa   : > { %s1038_s20 = smov (%p33_p0, %s31_s20), 0  ;;  %p101_p5 = scmp.eq.s32.totalorder %s543_s18, 0 }
   0xb   : > { %p856_p4 = por %p95_p2, %p94_p1  ;;  %s82_s23 = ssub.s32 %s779_s16, %s1038_s20 }
   0xc   : > { %p126_p6 = scmp.eq.s32.totalorder %s543_s18, 1  ;;  %p85_p7 = scmp.eq.s32.totalorder %s82_s23, 0 }
   0xd   : > { %p862_p8 = por %p101_p5, %p100_p3  ;;  %p132_p10 = scmp.eq.s32.totalorder %s544_s19, 1 }
   0xe   : > { %p866_p9 = por %p126_p6, %p94_p1  ;;  %p569_p13 = scmp.lt.s32.totalorder %s783_s17, 2 }
   0xf   : > { %s871_s26 = scalar_select %p85_p7, %s771_s14, %s87_s21  }
  0x10   : > { %s1025_s25 = scalar_select %p866_p9, 1, 0 }
  0x11   : > { %p873_p11 = por %p132_p10, %p100_p3  ;;  %s164_s28 = sand.u32 1, %s771_s14  }
  0x12   : > { %s553_s29 = smul.u32 48, %s164_s28  ;;  %p883_p0 = pnand %p569_p13, %p856_p4 }
  0x13   : > { %s1026_s27 = scalar_select %p873_p11, 1, 0 }
  0x14   : > { %s554_s30 = smul.u32 768, %s779_s16  ;;  %s168_s8 = scalar_lea.vmem [#allocation2], %s553_s29 }
  0x15   : > { %s177_s9 = sshll.u32 %s168_s8, 4  ;;  %s895_s10 = scalar_lea.sflag [#allocation3], %s164_s28  ;;  %s892_s9 = int_to_ptr.vmem [resolvable:$true] %s177_s9 }
  0x16   : > { %s890_s7 = scalar_lea.hbm %s1020_s2, %s554_s30  ;;  %p673_p3 = pneg %p883_p0 }
  0x17   : > { %s671_s11 = scalar_lea.hbm %s890_s7, 768  ;;  %s676_s21 = scalar_lea.hbm %s1020_s2, 1536 }
  0x18   : > { %p672_p2 = scmp.ne.s32.totalorder %s890_s7, %s671_s11  ;;  %p677_p6 = scmp.lt.u32.totalorder %s890_s7, %s1020_s2 }
  0x19   : > { %p678_p7 = scmp.lt.u32.totalorder %s676_s21, %s671_s11  ;;  %p680_p13 = scmp.lt.u32.totalorder %s671_s11, %s890_s7 }
  0x1a   : > { %p674_p4 = pnand %p673_p3, %p672_p2 }
  0x1b   : > { %p679_p10 = por %p678_p7, %p677_p6 }
  0x1c   : > { %p675_p5 = pneg %p674_p4 }
  0x1d   : > { %p681_p12 = por %p680_p13, %p679_p10 }
  0x1f   : > { %p682_p1 = pnand %p681_p12, %p675_p5 }
  0x21   : > { %685 = shalt.err (!%p682_p1)
}
  0x22   : > { %s686_s28 = scalar_lea.vmem %s892_s9, 768  ;;  %s785_s29 = smov [#allocation2]  }
  0x23   : > { %p687_p2 = scmp.ne.s32.totalorder %s892_s9, %s686_s28  ;;  %s691_s30 = sshll.u32 %s785_s29, 4  ;;  %s692_s30 = int_to_ptr.vmem [resolvable:$false] %s691_s30 }
  0x24   : > { %s693_s5 = scalar_lea.vmem %s692_s30, 1536  ;;  %p694_p9 = scmp.lt.s32.totalorder %s892_s9, %s692_s30 }
  0x25   : > { %p689_p4 = pnand %p687_p2, %p673_p3  ;;  %p695_p6 = scmp.lt.s32.totalorder %s693_s5, %s686_s28 }
  0x27   : > { %p690_p11 = pneg %p689_p4  ;;  %p696_p7 = por %p695_p6, %p694_p9 }
  0x29   : > { %p697_p10 = pnand %p696_p7, %p690_p11 }
  0x2b   : > { %700 = shalt.err (!%p697_p10)
}
  0x2c   : > { %s786_s6 = smov 256   ;;  %s787_s8 = smov 16  }
  0x2d   : > { %564 = dma.hbm_to_vmem [thread:$0]  (!%p883_p0), %s890_s7, 768, %s892_s9, %s895_s10, %s786_s6, %s786_s6, %s787_s8  }
  0x2e   : > { %p185_p12 = scmp.lt.s32.totalorder %s783_s17, 3  ;;  %p1028_p1 = scmp.ge.s32.totalorder %s783_s17, 1 }
  0x30   : > { %p186_p3 = pnand %p1028_p1, %p185_p12 }
  0x31   : > { %s927_s11 = sand.u32 (!%p186_p3), 1, %s767_s13  }
  0x32   : > { %189 = sbr.rel (%p186_p3) target bundleno = 232 (0xe8), region = 32  ;;  %s192_s19 = scalar_lea.sflag (!%p186_p3), [#allocation3], %s927_s11 }
  0x33   : > { %s555_s18 = smul.u32 (!%p186_p3), 48, %s927_s11 }
  0x35   : > { %s933_s21 = scalar_lea.vmem (!%p186_p3), [#allocation2], %s555_s18 }
  0x39   : > { %754 = dma.done.wait (%p862_p8), %s192_s19, 768  }
  0x3a   : > { %756 = vsyncadd (%p862_p8), %s192_s19, 4294966528  ;;  %v788_v0 = vmov 2   ;;  %v239_v1 = vld [vmem:[%s1018_s0 + $0x10] sm:$0xff]  ;;  %v237_v2 = vld [vmem:[%s1018_s0] sm:$0xff]  ;;  %v789_v4 = vmov 3   ;;  %v790_v5 = vmov 0   ;;  %v305_v28 = vlaneseq }
  0x3b   : > { %628 = vset.pattern.permute.xlu1 %v788_v0  ;;  %627 = vset.pattern.permute.xlu0 %v788_v0  ;;  %v238_v3 = vld [vmem:[%s1018_s0 + $0x8] sm:$0xff]  ;;  %vm371_vm1 = vcmp.gt.f32.partialorder %v237_v2, 0.5  ;;  %vm373_vm2 = vcmp.gt.f32.partialorder %v239_v1, 0.5  ;;  %v791_v9 = vmov 1   ;;  %v233_v10 = vld [vmem:[%s933_s21 + $0x10] sm:$0xff]  ;;  %v231_v14 = vld [vmem:[%s933_s21] sm:$0xff] }
  0x3c   : > { %301 = vperm.xlu1 %628, %v239_v1   ;;  %291 = vperm.xlu0 %627, %v237_v2   ;;  %vm372_vm0 = vcmp.gt.f32.partialorder %v238_v3, 0.5  ;;  %v380_v7 = vsel %vm371_vm1, 1, %v790_v5  ;;  %v382_v8 = vsel %vm373_vm2, 1, %v790_v5  ;;  %v234_v11 = vld [vmem:[%s933_s21 + $0x18] sm:$0xff]  ;;  %v243_v12 = vsub.f32 0.0, %v233_v10  ;;  %v232_v15 = vld [vmem:[%s933_s21 + $0x8] sm:$0xff] }
  0x3d   : > { %v381_v6 = vsel %vm372_vm0, 1, %v790_v5  ;;  %v244_v13 = vsub.f32 0.0, %v234_v11  ;;  %v241_v18 = vsub.f32 0.0, %v231_v14  ;;  %v235_v19 = vld [vmem:[%s933_s21 + $0x20] sm:$0xff]  ;;  %v242_v20 = vsub.f32 0.0, %v232_v15  ;;  %v236_v21 = vld [vmem:[%s933_s21 + $0x28] sm:$0xff] }
  0x3e   : > { %v251_v16 = vmul.f32 1.442695, %v243_v12  ;;  %v245_v22 = vsub.f32 0.0, %v235_v19  ;;  %v246_v24 = vsub.f32 0.0, %v236_v21  ;;  %v306_v31 = vshrl.u32 %v305_v28, 7  ;;  %s222_s29 = scalar_lea.vmem [#allocation5], %s555_s18 }
  0x3f   : > { %v253_v17 = vmul.f32 1.442695, %v244_v13  ;;  %v247_v23 = vmul.f32 1.442695, %v241_v18  ;;  %v249_v25 = vmul.f32 1.442695, %v242_v20 }
  0x40   : > { %629 = vset.pattern.permute.xlu1 %v789_v4  ;;  %296 = vperm.xlu0 %627, %v238_v3   ;;  %635 = vpow2.f32 %v251_v16  ;;  %v255_v26 = vmul.f32 1.442695, %v245_v22  ;;  %v257_v27 = vmul.f32 1.442695, %v246_v24  ;;  %v307_v34 = vsub.s32 0, %v306_v31  ;;  %s441_s30 = sshll.u32 %s222_s29, 4  ;;  %s964_s30 = int_to_ptr.vmem [resolvable:$true] %s441_s30 }
  0x41   : > { %330 = vperm.xlu1 %629, %v237_v2   ;;  %637 = vpow2.f32 %v253_v17  ;;  %v311_v35 = vsub.s32 2, %v306_v31  ;;  %v240_v37 = vld [vmem:[%s1019_s1] sm:$0xf]  ;;  %v343_v40 = vsub.s32 1, %v306_v31  ;;  %v347_v42 = vsub.s32 3, %v306_v31  ;;  %s556_s5 = smul.u32 768, %s775_s15 }
  0x42   : > { %639 = vpow2.f32 %v247_v23  ;;  %v308_v44 = vrot.slane %v240_v37, %v307_v34  ;;  %s426_s15 = scalar_lea.sflag [#allocation4], %s927_s11  ;;  %s701_s19 = scalar_lea.vmem %s964_s30, 768 }
  0x43   : > { %641 = vpow2.f32 %v249_v25  ;;  %v312_v45 = vrot.slane %v240_v37, %v311_v35  ;;  %v344_v48 = vrot.slane %v240_v37, %v343_v40  ;;  %v348_v51 = vrot.slane %v240_v37, %v347_v42  ;;  %s969_s18 = scalar_lea.hbm %s1021_s3, %s556_s5  ;;  %p702_p8 = scmp.ne.s32.totalorder %s964_s30, %s701_s19 }
  0x44   : > { %630 = vset.pattern.permute.xlu0 %v789_v4  ;;  %643 = vpow2.f32 %v255_v26  ;;  %v318_v54 = vrot.slane %v308_v44, %v307_v34  ;;  %p1029_p9 = scmp.ne.s32.totalorder %s1025_s25, 0  ;;  %s792_s21 = smov [#allocation5]  }
  0x45   : > { %338 = vperm.xlu1 %629, %v239_v1   ;;  %334 = vperm.xlu0 %630, %v238_v3   ;;  %645 = vpow2.f32 %v257_v27  ;;  %v322_v55 = vrot.slane %v312_v45, %v307_v34  ;;  %v354_v57 = vrot.slane %v344_v48, %v343_v40  ;;  %v358_v58 = vrot.slane %v348_v51, %v343_v40  ;;  %s705_s4 = sshll.u32 %s792_s21, 4  ;;  %s706_s4 = int_to_ptr.vmem [resolvable:$false] %s705_s4 }
  0x46   : > { %p703_p11 = pnand %p702_p8, %p1029_p9  ;;  %s707_s7 = scalar_lea.vmem %s706_s4, 1536 }
  0x47   : > { %p708_p5 = scmp.lt.s32.totalorder %s964_s30, %s706_s4  ;;  %p709_p13 = scmp.lt.s32.totalorder %s707_s7, %s701_s19 }
  0x48   : > { %p704_p0 = pneg %p703_p11 }
  0x49   : > { %631 = vset.pattern.permute.xlu1 %v790_v5  ;;  %632 = vset.pattern.permute.xlu0 %v790_v5  ;;  %p710_p2 = por %p709_p13, %p708_p5 }
  0x4a   : > { %387 = vperm.xlu0 %632, %v381_v6   ;;  %384 = vperm.xlu1 %631, %v380_v7   ;;  %v636_v29 = vpop.eup %635 }
  0x4b   : > { %v638_v30 = vpop.eup %637  ;;  %v261_v32 = vadd.f32 1.0, %v636_v29  ;;  %p711_p4 = pnand %p710_p2, %p704_p0 }
  0x4c   : > { %v262_v33 = vadd.f32 1.0, %v638_v30  ;;  %v640_v36 = vpop.eup %639 }
  0x4d   : > { %v642_v41 = vpop.eup %641  ;;  %647 = vrcp.f32 %v261_v32  ;;  %v259_v46 = vadd.f32 1.0, %v640_v36 }
  0x4e   : > { %634 = vset.pattern.permute.xlu0 %v791_v9  ;;  %390 = vperm.xlu1 %631, %v382_v8   ;;  %649 = vrcp.f32 %v262_v33  ;;  %v644_v43 = vpop.eup %643  ;;  %v260_v49 = vadd.f32 1.0, %v642_v41 }
  0x4f   : > { %406 = vperm.xlu0 %634, %v238_v3   ;;  %v646_v47 = vpop.eup %645  ;;  %651 = vrcp.f32 %v640_v36  ;;  %v263_v53 = vadd.f32 1.0, %v644_v43 }
  0x50   : > { %653 = vrcp.f32 %v636_v29  ;;  %v264_v56 = vadd.f32 1.0, %v646_v47 }
  0x51   : > { %655 = vrcp.f32 %v638_v30 }
  0x52   : > { %633 = vset.pattern.permute.xlu1 %v791_v9  ;;  %657 = vrcp.f32 %v259_v46 }
  0x53   : > { %402 = vperm.xlu1 %633, %v237_v2   ;;  %659 = vrcp.f32 %v260_v49 }
  0x54   : > { %661 = vrcp.f32 %v642_v41 }
  0x55   : > { %663 = vrcp.f32 %v263_v53 }
  0x56   : > { %665 = vrcp.f32 %v264_v56 }
  0x57   : > { %410 = vperm.xlu1 %633, %v239_v1   ;;  %v648_v63 = vpop.eup %647  ;;  %667 = vrcp.f32 %v644_v43 }
  0x58   : > { %v650_v2 = vpop.eup %649  ;;  %669 = vrcp.f32 %v646_v47 }
  0x59   : > { %v652_v9 = vpop.eup %651 }
  0x5a   : > { %v654_v12 = vpop.eup %653 }
  0x5b   : > { %v656_v15 = vpop.eup %655 }
  0x5c   : > { %v658_v16 = vpop.eup %657 }
  0x5d   : > { %v660_v21 = vpop.eup %659 }
  0x5e   : > { %v662_v23 = vpop.eup %661 }
  0x5f   : > { %v664_v29 = vpop.eup %663 }
  0x60   : > { %v666_v32 = vpop.eup %665 }
  0x61   : > { %v668_v37 = vpop.eup %667 }
  0x62   : > { %v670_v41 = vpop.eup %669 }
  0xbb   : > { %v957_v38 = vpop.permute.xlu1 %301  ;;  %v292_v39 = vpop.permute.xlu0 %291 }
  0xbc   : > { %v323_v3 = vmul.f32 %v318_v54, %v292_v39  ;;  %v324_v4 = vmul.f32 %v322_v55, %v292_v39  ;;  %v327_v24 = vmul.f32 %v318_v54, %v957_v38  ;;  %v328_v25 = vmul.f32 %v322_v55, %v957_v38 }
  0xbf   : > { %v297_v50 = vpop.permute.xlu0 %296 }
  0xc0   : > { %v331_v52 = vpop.permute.xlu1 %330  ;;  %v325_v59 = vmul.f32 %v318_v54, %v297_v50  ;;  %v326_v60 = vmul.f32 %v322_v55, %v297_v50 }
  0xc1   : > { %v359_v5 = vmul.f32 %v354_v57, %v331_v52  ;;  %v360_v6 = vmul.f32 %v358_v58, %v331_v52 }
  0xc3   : > { %v365_v17 = vadd.f32 %v359_v5, %v323_v3  ;;  %v366_v18 = vadd.f32 %v360_v6, %v324_v4 }
  0xc4   : > { %v339_v61 = vpop.permute.xlu1 %338  ;;  %v335_v62 = vpop.permute.xlu0 %334 }
  0xc5   : > { %v361_v0 = vmul.f32 %v354_v57, %v335_v62  ;;  %v362_v1 = vmul.f32 %v358_v58, %v335_v62  ;;  %v363_v19 = vmul.f32 %v354_v57, %v339_v61  ;;  %v364_v20 = vmul.f32 %v358_v58, %v339_v61 }
  0xc6   : > { %v374_v33 = vadd.f32 %v658_v16, %v365_v17  ;;  %v375_v34 = vadd.f32 %v660_v21, %v366_v18 }
  0xc7   : > { %v367_v7 = vadd.f32 %v361_v0, %v325_v59  ;;  %v368_v8 = vadd.f32 %v362_v1, %v326_v60  ;;  %v369_v35 = vadd.f32 %v363_v19, %v327_v24  ;;  %v370_v36 = vadd.f32 %v364_v20, %v328_v25 }
  0xc9   : > { %v388_v10 = vpop.permute.xlu0 %387  ;;  %v385_v11 = vpop.permute.xlu1 %384  ;;  %v376_v13 = vadd.f32 %v648_v63, %v367_v7  ;;  %v377_v14 = vadd.f32 %v650_v2, %v368_v8  ;;  %v378_v44 = vadd.f32 %v664_v29, %v369_v35  ;;  %v379_v45 = vadd.f32 %v666_v32, %v370_v36 }
  0xca   : > { %vm393_vm3 = vcmp.eq.s32.totalorder %v388_v10, 1  ;;  %vm392_vm4 = vcmp.eq.s32.totalorder %v385_v11, 1 }
  0xcb   : > { %v397_v27 = vsel %vm393_vm3, %v654_v12, %v376_v13  ;;  %v398_v28 = vsel %vm393_vm3, %v656_v15, %v377_v14  ;;  %v395_v39 = vsel %vm392_vm4, %v652_v9, %v374_v33  ;;  %v396_v40 = vsel %vm392_vm4, %v662_v23, %v375_v34 }
  0xcd   : > { %v391_v22 = vpop.permute.xlu1 %390 }
  0xce   : > { %v407_v26 = vpop.permute.xlu0 %406  ;;  %vm394_vm5 = vcmp.eq.s32.totalorder %v391_v22, 1 }
  0xcf   : > { %v415_v30 = vmul.f32 %v407_v26, %v397_v27  ;;  %v416_v31 = vmul.f32 %v407_v26, %v398_v28  ;;  %v399_v47 = vsel %vm394_vm5, %v668_v37, %v378_v44  ;;  %v400_v48 = vsel %vm394_vm5, %v670_v41, %v379_v45 }
  0xd1   : > { %421 = vst [vmem:[%s222_s29 + $0x10] sm:$0xff] %v415_v30  ;;  %422 = vst [vmem:[%s222_s29 + $0x18] sm:$0xff] %v416_v31 }
  0xd2   : > { %v403_v38 = vpop.permute.xlu1 %402 }
  0xd3   : > { %v413_v42 = vmul.f32 %v403_v38, %v395_v39  ;;  %v414_v43 = vmul.f32 %v403_v38, %v396_v40 }
  0xd5   : > { %419 = vst [vmem:[%s222_s29] sm:$0xff] %v413_v42  ;;  %420 = vst [vmem:[%s222_s29 + $0x8] sm:$0xff] %v414_v43 }
  0xd6   : > { %v411_v46 = vpop.permute.xlu1 %410 }
  0xd7   : > { %v417_v49 = vmul.f32 %v411_v46, %v399_v47  ;;  %v418_v50 = vmul.f32 %v411_v46, %v400_v48 }
  0xd9   : > { %423 = vst [vmem:[%s222_s29 + $0x20] sm:$0xff] %v417_v49  ;;  %424 = vst [vmem:[%s222_s29 + $0x28] sm:$0xff] %v418_v50 }
  0xda   : > { %714 = shalt.err (!%p711_p4)
}
  0xdb   : > { %s715_s9 = scalar_lea.hbm %s969_s18, 768  ;;  %s719_s23 = scalar_lea.hbm %s1021_s3, 1536 }
  0xdc   : > { %p716_p6 = scmp.ne.s32.totalorder %s969_s18, %s715_s9  ;;  %p720_p12 = scmp.lt.u32.totalorder %s969_s18, %s1021_s3 }
  0xdd   : > { %p721_p1 = scmp.lt.u32.totalorder %s719_s23, %s715_s9  ;;  %p723_p8 = scmp.lt.u32.totalorder %s715_s9, %s969_s18 }
  0xde   : > { %p717_p7 = pnand %p716_p6, %p1029_p9 }
  0xdf   : > { %p722_p3 = por %p721_p1, %p720_p12 }
  0xe0   : > { %p718_p10 = pneg %p717_p7 }
  0xe1   : > { %p724_p11 = por %p723_p8, %p722_p3 }
  0xe3   : > { %p725_p0 = pnand %p724_p11, %p718_p10 }
  0xe5   : > { %728 = shalt.err (!%p725_p0)
}
  0xe6   : > { %s793_s29 = smov 256   ;;  %s794_s5 = smov 16  }
  0xe7   : > { %559 = dma.vmem_to_hbm [thread:$0]  (%p1029_p9), %s964_s30, 768, %s969_s18, %s426_s15, %s793_s29, %s793_s29, %s794_s5  }
  0xe8 PF: > { %s456_s6 = sand.u32 1, %s763_s12   ;;  %p1030_p5 = scmp.ne.s32.totalorder %s1026_s27, 0 }
  0xe9   : > { %p1031_p13 = scmp.ge.s32.totalorder %s783_s17, 2  ;;  %s457_s8 = scalar_lea.sflag [#allocation4], %s456_s6 }
  0xeb   : > { %p566_p2 = pnand %p1031_p13, %p1030_p5 }
  0xed   : > { %758 = dma.done.wait (!%p566_p2), %s457_s8, 768  }
  0xee   : > { %760 = vsyncadd (!%p566_p2), %s457_s8, 4294966528  ;;  %s19_s17 = sadd.s32 1, %s783_s17   ;;  %s1032_s12 = smov %s767_s13 }
  0xef   : > { %p16_p4 = scmp.ge.s32.totalorder %s19_s17, 4   ;;  %s1033_s13 = smov %s771_s14 }
  0xf0   : > { %s1034_s14 = smov %s871_s26  ;;  %s1035_s15 = smov %s779_s16 }
  0xf1   : > { %s1036_s16 = smov %s1038_s20  ;;  %18 = sbr.rel (!%p16_p4) target bundleno = 6 (0x6), region = 80 }
  0xf8   :  { %462 = vsyncpa [#allocation3], 1 }
  0xf9   :  { %464 = vsyncpa [#allocation3 + $0x1], 1 }
  0xfa   :  { %465 = vsyncpa [#allocation4], 1 }
  0xfb   :  { %467 = vsyncpa [#allocation4 + $0x1], 1 }

</bundles_post_ra>
